<compile_context>
chip_gen: v7x
topology: tpu7x:2x2x1
jax: 0.10.0
libtpu: 0.0.40
codegen_flags: <defaults>
</compile_context>

<pallas_src>
import jax
import jax.numpy as jnp
from jax.experimental import pallas as pl
from jax.experimental.pallas import tpu as pltpu

D_IN, D_H1, D_H2, D_OUT = 8, 6, 4, 1

# Flat f32 parameter-slab layout (87 scalars; lives in SMEM inside the kernel).
W1_OFF = 0                        # (6, 8) row-major
B1_OFF = W1_OFF + D_H1 * D_IN     # (6,)
W2_OFF = B1_OFF + D_H1            # (4, 6) row-major
B2_OFF = W2_OFF + D_H2 * D_H1     # (4,)
W3_OFF = B2_OFF + D_H2            # (1, 4) row-major
B3_OFF = W3_OFF + D_OUT * D_H2    # (1,)
N_PARAMS = B3_OFF + D_OUT         # 87


def mlp_kernel(p_ref, x_ref, o_ref):
    """One batch tile: x_ref is (8, TB) with batch on lanes; o_ref is (1, TB)."""
    x = x_ref[...]                                   # (8, TB) f32
    x_rows = [x[k:k + 1, :] for k in range(D_IN)]    # 8 x (1, TB)

    def dense(in_rows, in_dim, out_dim, w_off, b_off):
        # VPU broadcast-FMA chain over SMEM scalars; the MXU is never touched.
        out_rows = []
        for j in range(out_dim):
            row_off = w_off + j * in_dim
            acc = p_ref[row_off] * in_rows[0] + p_ref[b_off + j]
            for k in range(1, in_dim):
                acc = acc + p_ref[row_off + k] * in_rows[k]
            out_rows.append(acc)
        return out_rows

    h1 = [jnp.maximum(r, 0.0) for r in dense(x_rows, D_IN, D_H1, W1_OFF, B1_OFF)]
    h2 = [jnp.maximum(r, 0.0) for r in dense(h1, D_H1, D_H2, W2_OFF, B2_OFF)]
    (z,) = dense(h2, D_H2, D_OUT, W3_OFF, B3_OFF)    # (1, TB) pre-sigmoid

    # Numerically stable sigmoid via tanh: EUP slot, no divide, no exp overflow.
    o_ref[...] = (0.5 * (jnp.tanh(0.5 * z) + 1.0)).astype(o_ref.dtype)


def mlp_forward(x, params, *, tile_b=2048):
    """x: (B, 8) float -> (B, 1) float32.  Same semantics as the PyTorch module."""
    w1, b1, w2, b2, w3, b3 = params   # PyTorch convention: w is (out, in), b is (out,)
    B = x.shape[0]

    # Single packed parameter slab -> one transfer instead of six tiny ones.
    p = jnp.concatenate([w1.reshape(-1), b1.reshape(-1),
                         w2.reshape(-1), b2.reshape(-1),
                         w3.reshape(-1), b3.reshape(-1)]).astype(jnp.float32)

    # Batch goes on the lane (last) axis; pad to a multiple of the tile (>=128 lanes).
    tb = min(tile_b, max(128, pl.cdiv(B, 128) * 128))
    bp = pl.cdiv(B, tb) * tb
    xt = jnp.zeros((D_IN, bp), jnp.float32).at[:, :B].set(x.T.astype(jnp.float32))

    out_t = pl.pallas_call(
        mlp_kernel,
        out_shape=jax.ShapeDtypeStruct((D_OUT, bp), jnp.float32),
        grid=(bp // tb,),
        in_specs=[
            pl.BlockSpec(memory_space=pltpu.MemorySpace.SMEM),   # packed params (87 f32)
            pl.BlockSpec((D_IN, tb), lambda i: (0, i)),          # batch tile, lane-dense
        ],
        out_specs=pl.BlockSpec((D_OUT, tb), lambda i: (0, i)),   # lane-dense output tile
        compiler_params=pltpu.CompilerParams(
            dimension_semantics=("parallel",)),                  # v7x: shard batch over TCs
    )(p, xt)

    return out_t[0, :B].reshape(B, 1)


def init_params(key):
    """Deterministic init mimicking PyTorch Linear default U(-1/sqrt(fan_in), +)."""
    dims = [(D_IN, D_H1), (D_H1, D_H2), (D_H2, D_OUT)]
    params = []
    for fan_in, fan_out in dims:
        key, kw, kb = jax.random.split(key, 3)
        bound = 1.0 / (fan_in ** 0.5)
        w = jax.random.uniform(kw, (fan_out, fan_in), jnp.float32, -bound, bound)
        b = jax.random.uniform(kb, (fan_out,), jnp.float32, -bound, bound)
        params += [w, b]
    return tuple(params)


def reference_forward(x, params):
    w1, b1, w2, b2, w3, b3 = params
    h = jnp.maximum(x @ w1.T + b1, 0.0)
    h = jnp.maximum(h @ w2.T + b2, 0.0)
    return jax.nn.sigmoid(h @ w3.T + b3)


if __name__ == "__main__":
    key = jax.random.PRNGKey(0)
    kx, kp = jax.random.split(key)

    B = 32  # small batch
    x = jax.random.normal(kx, (B, D_IN), dtype=jnp.float32)
    params = init_params(kp)

    out = jax.block_until_ready(mlp_forward(x, params))
    ref = reference_forward(x, params)

    assert out.shape == (B, D_OUT)
    assert jnp.allclose(out, ref, atol=5e-5, rtol=1e-4), float(jnp.max(jnp.abs(out - ref)))
    print("KERNEL_OK")
</pallas_src>

<mosaic_0001>
module attributes {stable_mosaic.version = 11 : i64} {
  func.func @mlp_kernel(%arg0: i32, %arg1: memref<87xf32, #tpu.memory_space<smem>>, %arg2: memref<8x128xf32, #tpu.memory_space<vmem>>, %arg3: memref<1x128xf32, #tpu.memory_space<vmem>>) attributes {dimension_semantics = [#tpu.dimension_semantics<parallel>], iteration_bounds = array<i64: 1>, scalar_prefetch = 0 : i64, scratch_operands = 0 : i64, tpu.core_type = #tpu.core_type<tc>, window_params = [{transform_indices = @transform_0, window_bounds = array<i64: 87>}, {transform_indices = @transform_1, window_bounds = array<i64: 8, 128>}, {transform_indices = @transform_2, window_bounds = array<i64: 1, 128>}]} {
    %c0 = arith.constant 0 : index
    %c0_0 = arith.constant 0 : index
    %0 = vector.load %arg2[%c0, %c0_0] : memref<8x128xf32, #tpu.memory_space<vmem>>, vector<8x128xf32>
    %1 = vector.extract_strided_slice %0 {offsets = [0, 0], sizes = [1, 128], strides = [1, 1]} : vector<8x128xf32> to vector<1x128xf32>
    %2 = vector.extract_strided_slice %0 {offsets = [1, 0], sizes = [1, 128], strides = [1, 1]} : vector<8x128xf32> to vector<1x128xf32>
    %3 = vector.extract_strided_slice %0 {offsets = [2, 0], sizes = [1, 128], strides = [1, 1]} : vector<8x128xf32> to vector<1x128xf32>
    %4 = vector.extract_strided_slice %0 {offsets = [3, 0], sizes = [1, 128], strides = [1, 1]} : vector<8x128xf32> to vector<1x128xf32>
    %5 = vector.extract_strided_slice %0 {offsets = [4, 0], sizes = [1, 128], strides = [1, 1]} : vector<8x128xf32> to vector<1x128xf32>
    %6 = vector.extract_strided_slice %0 {offsets = [5, 0], sizes = [1, 128], strides = [1, 1]} : vector<8x128xf32> to vector<1x128xf32>
    %7 = vector.extract_strided_slice %0 {offsets = [6, 0], sizes = [1, 128], strides = [1, 1]} : vector<8x128xf32> to vector<1x128xf32>
    %8 = vector.extract_strided_slice %0 {offsets = [7, 0], sizes = [1, 128], strides = [1, 1]} : vector<8x128xf32> to vector<1x128xf32>
    %c0_1 = arith.constant 0 : index
    %9 = memref.load %arg1[%c0_1] : memref<87xf32, #tpu.memory_space<smem>>
    %10 = vector.broadcast %9 : f32 to vector<1x128xf32>
    %11 = arith.mulf %10, %1 : vector<1x128xf32>
    %c48 = arith.constant 48 : index
    %12 = memref.load %arg1[%c48] : memref<87xf32, #tpu.memory_space<smem>>
    %13 = vector.broadcast %12 : f32 to vector<1x128xf32>
    %14 = arith.addf %11, %13 : vector<1x128xf32>
    %c1 = arith.constant 1 : index
    %15 = memref.load %arg1[%c1] : memref<87xf32, #tpu.memory_space<smem>>
    %16 = vector.broadcast %15 : f32 to vector<1x128xf32>
    %17 = arith.mulf %16, %2 : vector<1x128xf32>
    %18 = arith.addf %14, %17 : vector<1x128xf32>
    %c2 = arith.constant 2 : index
    %19 = memref.load %arg1[%c2] : memref<87xf32, #tpu.memory_space<smem>>
    %20 = vector.broadcast %19 : f32 to vector<1x128xf32>
    %21 = arith.mulf %20, %3 : vector<1x128xf32>
    %22 = arith.addf %18, %21 : vector<1x128xf32>
    %c3 = arith.constant 3 : index
    %23 = memref.load %arg1[%c3] : memref<87xf32, #tpu.memory_space<smem>>
    %24 = vector.broadcast %23 : f32 to vector<1x128xf32>
    %25 = arith.mulf %24, %4 : vector<1x128xf32>
    %26 = arith.addf %22, %25 : vector<1x128xf32>
    %c4 = arith.constant 4 : index
    %27 = memref.load %arg1[%c4] : memref<87xf32, #tpu.memory_space<smem>>
    %28 = vector.broadcast %27 : f32 to vector<1x128xf32>
    %29 = arith.mulf %28, %5 : vector<1x128xf32>
    %30 = arith.addf %26, %29 : vector<1x128xf32>
    %c5 = arith.constant 5 : index
    %31 = memref.load %arg1[%c5] : memref<87xf32, #tpu.memory_space<smem>>
    %32 = vector.broadcast %31 : f32 to vector<1x128xf32>
    %33 = arith.mulf %32, %6 : vector<1x128xf32>
    %34 = arith.addf %30, %33 : vector<1x128xf32>
    %c6 = arith.constant 6 : index
    %35 = memref.load %arg1[%c6] : memref<87xf32, #tpu.memory_space<smem>>
    %36 = vector.broadcast %35 : f32 to vector<1x128xf32>
    %37 = arith.mulf %36, %7 : vector<1x128xf32>
    %38 = arith.addf %34, %37 : vector<1x128xf32>
    %c7 = arith.constant 7 : index
    %39 = memref.load %arg1[%c7] : memref<87xf32, #tpu.memory_space<smem>>
    %40 = vector.broadcast %39 : f32 to vector<1x128xf32>
    %41 = arith.mulf %40, %8 : vector<1x128xf32>
    %42 = arith.addf %38, %41 : vector<1x128xf32>
    %c8 = arith.constant 8 : index
    %43 = memref.load %arg1[%c8] : memref<87xf32, #tpu.memory_space<smem>>
    %44 = vector.broadcast %43 : f32 to vector<1x128xf32>
    %45 = arith.mulf %44, %1 : vector<1x128xf32>
    %c49 = arith.constant 49 : index
    %46 = memref.load %arg1[%c49] : memref<87xf32, #tpu.memory_space<smem>>
    %47 = vector.broadcast %46 : f32 to vector<1x128xf32>
    %48 = arith.addf %45, %47 : vector<1x128xf32>
    %c9 = arith.constant 9 : index
    %49 = memref.load %arg1[%c9] : memref<87xf32, #tpu.memory_space<smem>>
    %50 = vector.broadcast %49 : f32 to vector<1x128xf32>
    %51 = arith.mulf %50, %2 : vector<1x128xf32>
    %52 = arith.addf %48, %51 : vector<1x128xf32>
    %c10 = arith.constant 10 : index
    %53 = memref.load %arg1[%c10] : memref<87xf32, #tpu.memory_space<smem>>
    %54 = vector.broadcast %53 : f32 to vector<1x128xf32>
    %55 = arith.mulf %54, %3 : vector<1x128xf32>
    %56 = arith.addf %52, %55 : vector<1x128xf32>
    %c11 = arith.constant 11 : index
    %57 = memref.load %arg1[%c11] : memref<87xf32, #tpu.memory_space<smem>>
    %58 = vector.broadcast %57 : f32 to vector<1x128xf32>
    %59 = arith.mulf %58, %4 : vector<1x128xf32>
    %60 = arith.addf %56, %59 : vector<1x128xf32>
    %c12 = arith.constant 12 : index
    %61 = memref.load %arg1[%c12] : memref<87xf32, #tpu.memory_space<smem>>
    %62 = vector.broadcast %61 : f32 to vector<1x128xf32>
    %63 = arith.mulf %62, %5 : vector<1x128xf32>
    %64 = arith.addf %60, %63 : vector<1x128xf32>
    %c13 = arith.constant 13 : index
    %65 = memref.load %arg1[%c13] : memref<87xf32, #tpu.memory_space<smem>>
    %66 = vector.broadcast %65 : f32 to vector<1x128xf32>
    %67 = arith.mulf %66, %6 : vector<1x128xf32>
    %68 = arith.addf %64, %67 : vector<1x128xf32>
    %c14 = arith.constant 14 : index
    %69 = memref.load %arg1[%c14] : memref<87xf32, #tpu.memory_space<smem>>
    %70 = vector.broadcast %69 : f32 to vector<1x128xf32>
    %71 = arith.mulf %70, %7 : vector<1x128xf32>
    %72 = arith.addf %68, %71 : vector<1x128xf32>
    %c15 = arith.constant 15 : index
    %73 = memref.load %arg1[%c15] : memref<87xf32, #tpu.memory_space<smem>>
    %74 = vector.broadcast %73 : f32 to vector<1x128xf32>
    %75 = arith.mulf %74, %8 : vector<1x128xf32>
    %76 = arith.addf %72, %75 : vector<1x128xf32>
    %c16 = arith.constant 16 : index
    %77 = memref.load %arg1[%c16] : memref<87xf32, #tpu.memory_space<smem>>
    %78 = vector.broadcast %77 : f32 to vector<1x128xf32>
    %79 = arith.mulf %78, %1 : vector<1x128xf32>
    %c50 = arith.constant 50 : index
    %80 = memref.load %arg1[%c50] : memref<87xf32, #tpu.memory_space<smem>>
    %81 = vector.broadcast %80 : f32 to vector<1x128xf32>
    %82 = arith.addf %79, %81 : vector<1x128xf32>
    %c17 = arith.constant 17 : index
    %83 = memref.load %arg1[%c17] : memref<87xf32, #tpu.memory_space<smem>>
    %84 = vector.broadcast %83 : f32 to vector<1x128xf32>
    %85 = arith.mulf %84, %2 : vector<1x128xf32>
    %86 = arith.addf %82, %85 : vector<1x128xf32>
    %c18 = arith.constant 18 : index
    %87 = memref.load %arg1[%c18] : memref<87xf32, #tpu.memory_space<smem>>
    %88 = vector.broadcast %87 : f32 to vector<1x128xf32>
    %89 = arith.mulf %88, %3 : vector<1x128xf32>
    %90 = arith.addf %86, %89 : vector<1x128xf32>
    %c19 = arith.constant 19 : index
    %91 = memref.load %arg1[%c19] : memref<87xf32, #tpu.memory_space<smem>>
    %92 = vector.broadcast %91 : f32 to vector<1x128xf32>
    %93 = arith.mulf %92, %4 : vector<1x128xf32>
    %94 = arith.addf %90, %93 : vector<1x128xf32>
    %c20 = arith.constant 20 : index
    %95 = memref.load %arg1[%c20] : memref<87xf32, #tpu.memory_space<smem>>
    %96 = vector.broadcast %95 : f32 to vector<1x128xf32>
    %97 = arith.mulf %96, %5 : vector<1x128xf32>
    %98 = arith.addf %94, %97 : vector<1x128xf32>
    %c21 = arith.constant 21 : index
    %99 = memref.load %arg1[%c21] : memref<87xf32, #tpu.memory_space<smem>>
    %100 = vector.broadcast %99 : f32 to vector<1x128xf32>
    %101 = arith.mulf %100, %6 : vector<1x128xf32>
    %102 = arith.addf %98, %101 : vector<1x128xf32>
    %c22 = arith.constant 22 : index
    %103 = memref.load %arg1[%c22] : memref<87xf32, #tpu.memory_space<smem>>
    %104 = vector.broadcast %103 : f32 to vector<1x128xf32>
    %105 = arith.mulf %104, %7 : vector<1x128xf32>
    %106 = arith.addf %102, %105 : vector<1x128xf32>
    %c23 = arith.constant 23 : index
    %107 = memref.load %arg1[%c23] : memref<87xf32, #tpu.memory_space<smem>>
    %108 = vector.broadcast %107 : f32 to vector<1x128xf32>
    %109 = arith.mulf %108, %8 : vector<1x128xf32>
    %110 = arith.addf %106, %109 : vector<1x128xf32>
    %c24 = arith.constant 24 : index
    %111 = memref.load %arg1[%c24] : memref<87xf32, #tpu.memory_space<smem>>
    %112 = vector.broadcast %111 : f32 to vector<1x128xf32>
    %113 = arith.mulf %112, %1 : vector<1x128xf32>
    %c51 = arith.constant 51 : index
    %114 = memref.load %arg1[%c51] : memref<87xf32, #tpu.memory_space<smem>>
    %115 = vector.broadcast %114 : f32 to vector<1x128xf32>
    %116 = arith.addf %113, %115 : vector<1x128xf32>
    %c25 = arith.constant 25 : index
    %117 = memref.load %arg1[%c25] : memref<87xf32, #tpu.memory_space<smem>>
    %118 = vector.broadcast %117 : f32 to vector<1x128xf32>
    %119 = arith.mulf %118, %2 : vector<1x128xf32>
    %120 = arith.addf %116, %119 : vector<1x128xf32>
    %c26 = arith.constant 26 : index
    %121 = memref.load %arg1[%c26] : memref<87xf32, #tpu.memory_space<smem>>
    %122 = vector.broadcast %121 : f32 to vector<1x128xf32>
    %123 = arith.mulf %122, %3 : vector<1x128xf32>
    %124 = arith.addf %120, %123 : vector<1x128xf32>
    %c27 = arith.constant 27 : index
    %125 = memref.load %arg1[%c27] : memref<87xf32, #tpu.memory_space<smem>>
    %126 = vector.broadcast %125 : f32 to vector<1x128xf32>
    %127 = arith.mulf %126, %4 : vector<1x128xf32>
    %128 = arith.addf %124, %127 : vector<1x128xf32>
    %c28 = arith.constant 28 : index
    %129 = memref.load %arg1[%c28] : memref<87xf32, #tpu.memory_space<smem>>
    %130 = vector.broadcast %129 : f32 to vector<1x128xf32>
    %131 = arith.mulf %130, %5 : vector<1x128xf32>
    %132 = arith.addf %128, %131 : vector<1x128xf32>
    %c29 = arith.constant 29 : index
    %133 = memref.load %arg1[%c29] : memref<87xf32, #tpu.memory_space<smem>>
    %134 = vector.broadcast %133 : f32 to vector<1x128xf32>
    %135 = arith.mulf %134, %6 : vector<1x128xf32>
    %136 = arith.addf %132, %135 : vector<1x128xf32>
    %c30 = arith.constant 30 : index
    %137 = memref.load %arg1[%c30] : memref<87xf32, #tpu.memory_space<smem>>
    %138 = vector.broadcast %137 : f32 to vector<1x128xf32>
    %139 = arith.mulf %138, %7 : vector<1x128xf32>
    %140 = arith.addf %136, %139 : vector<1x128xf32>
    %c31 = arith.constant 31 : index
    %141 = memref.load %arg1[%c31] : memref<87xf32, #tpu.memory_space<smem>>
    %142 = vector.broadcast %141 : f32 to vector<1x128xf32>
    %143 = arith.mulf %142, %8 : vector<1x128xf32>
    %144 = arith.addf %140, %143 : vector<1x128xf32>
    %c32 = arith.constant 32 : index
    %145 = memref.load %arg1[%c32] : memref<87xf32, #tpu.memory_space<smem>>
    %146 = vector.broadcast %145 : f32 to vector<1x128xf32>
    %147 = arith.mulf %146, %1 : vector<1x128xf32>
    %c52 = arith.constant 52 : index
    %148 = memref.load %arg1[%c52] : memref<87xf32, #tpu.memory_space<smem>>
    %149 = vector.broadcast %148 : f32 to vector<1x128xf32>
    %150 = arith.addf %147, %149 : vector<1x128xf32>
    %c33 = arith.constant 33 : index
    %151 = memref.load %arg1[%c33] : memref<87xf32, #tpu.memory_space<smem>>
    %152 = vector.broadcast %151 : f32 to vector<1x128xf32>
    %153 = arith.mulf %152, %2 : vector<1x128xf32>
    %154 = arith.addf %150, %153 : vector<1x128xf32>
    %c34 = arith.constant 34 : index
    %155 = memref.load %arg1[%c34] : memref<87xf32, #tpu.memory_space<smem>>
    %156 = vector.broadcast %155 : f32 to vector<1x128xf32>
    %157 = arith.mulf %156, %3 : vector<1x128xf32>
    %158 = arith.addf %154, %157 : vector<1x128xf32>
    %c35 = arith.constant 35 : index
    %159 = memref.load %arg1[%c35] : memref<87xf32, #tpu.memory_space<smem>>
    %160 = vector.broadcast %159 : f32 to vector<1x128xf32>
    %161 = arith.mulf %160, %4 : vector<1x128xf32>
    %162 = arith.addf %158, %161 : vector<1x128xf32>
    %c36 = arith.constant 36 : index
    %163 = memref.load %arg1[%c36] : memref<87xf32, #tpu.memory_space<smem>>
    %164 = vector.broadcast %163 : f32 to vector<1x128xf32>
    %165 = arith.mulf %164, %5 : vector<1x128xf32>
    %166 = arith.addf %162, %165 : vector<1x128xf32>
    %c37 = arith.constant 37 : index
    %167 = memref.load %arg1[%c37] : memref<87xf32, #tpu.memory_space<smem>>
    %168 = vector.broadcast %167 : f32 to vector<1x128xf32>
    %169 = arith.mulf %168, %6 : vector<1x128xf32>
    %170 = arith.addf %166, %169 : vector<1x128xf32>
    %c38 = arith.constant 38 : index
    %171 = memref.load %arg1[%c38] : memref<87xf32, #tpu.memory_space<smem>>
    %172 = vector.broadcast %171 : f32 to vector<1x128xf32>
    %173 = arith.mulf %172, %7 : vector<1x128xf32>
    %174 = arith.addf %170, %173 : vector<1x128xf32>
    %c39 = arith.constant 39 : index
    %175 = memref.load %arg1[%c39] : memref<87xf32, #tpu.memory_space<smem>>
    %176 = vector.broadcast %175 : f32 to vector<1x128xf32>
    %177 = arith.mulf %176, %8 : vector<1x128xf32>
    %178 = arith.addf %174, %177 : vector<1x128xf32>
    %c40 = arith.constant 40 : index
    %179 = memref.load %arg1[%c40] : memref<87xf32, #tpu.memory_space<smem>>
    %180 = vector.broadcast %179 : f32 to vector<1x128xf32>
    %181 = arith.mulf %180, %1 : vector<1x128xf32>
    %c53 = arith.constant 53 : index
    %182 = memref.load %arg1[%c53] : memref<87xf32, #tpu.memory_space<smem>>
    %183 = vector.broadcast %182 : f32 to vector<1x128xf32>
    %184 = arith.addf %181, %183 : vector<1x128xf32>
    %c41 = arith.constant 41 : index
    %185 = memref.load %arg1[%c41] : memref<87xf32, #tpu.memory_space<smem>>
    %186 = vector.broadcast %185 : f32 to vector<1x128xf32>
    %187 = arith.mulf %186, %2 : vector<1x128xf32>
    %188 = arith.addf %184, %187 : vector<1x128xf32>
    %c42 = arith.constant 42 : index
    %189 = memref.load %arg1[%c42] : memref<87xf32, #tpu.memory_space<smem>>
    %190 = vector.broadcast %189 : f32 to vector<1x128xf32>
    %191 = arith.mulf %190, %3 : vector<1x128xf32>
    %192 = arith.addf %188, %191 : vector<1x128xf32>
    %c43 = arith.constant 43 : index
    %193 = memref.load %arg1[%c43] : memref<87xf32, #tpu.memory_space<smem>>
    %194 = vector.broadcast %193 : f32 to vector<1x128xf32>
    %195 = arith.mulf %194, %4 : vector<1x128xf32>
    %196 = arith.addf %192, %195 : vector<1x128xf32>
    %c44 = arith.constant 44 : index
    %197 = memref.load %arg1[%c44] : memref<87xf32, #tpu.memory_space<smem>>
    %198 = vector.broadcast %197 : f32 to vector<1x128xf32>
    %199 = arith.mulf %198, %5 : vector<1x128xf32>
    %200 = arith.addf %196, %199 : vector<1x128xf32>
    %c45 = arith.constant 45 : index
    %201 = memref.load %arg1[%c45] : memref<87xf32, #tpu.memory_space<smem>>
    %202 = vector.broadcast %201 : f32 to vector<1x128xf32>
    %203 = arith.mulf %202, %6 : vector<1x128xf32>
    %204 = arith.addf %200, %203 : vector<1x128xf32>
    %c46 = arith.constant 46 : index
    %205 = memref.load %arg1[%c46] : memref<87xf32, #tpu.memory_space<smem>>
    %206 = vector.broadcast %205 : f32 to vector<1x128xf32>
    %207 = arith.mulf %206, %7 : vector<1x128xf32>
    %208 = arith.addf %204, %207 : vector<1x128xf32>
    %c47 = arith.constant 47 : index
    %209 = memref.load %arg1[%c47] : memref<87xf32, #tpu.memory_space<smem>>
    %210 = vector.broadcast %209 : f32 to vector<1x128xf32>
    %211 = arith.mulf %210, %8 : vector<1x128xf32>
    %212 = arith.addf %208, %211 : vector<1x128xf32>
    %cst = arith.constant 0.000000e+00 : f32
    %213 = vector.broadcast %cst : f32 to vector<1x128xf32>
    %214 = arith.maximumf %42, %213 : vector<1x128xf32>
    %cst_2 = arith.constant 0.000000e+00 : f32
    %215 = vector.broadcast %cst_2 : f32 to vector<1x128xf32>
    %216 = arith.maximumf %76, %215 : vector<1x128xf32>
    %cst_3 = arith.constant 0.000000e+00 : f32
    %217 = vector.broadcast %cst_3 : f32 to vector<1x128xf32>
    %218 = arith.maximumf %110, %217 : vector<1x128xf32>
    %cst_4 = arith.constant 0.000000e+00 : f32
    %219 = vector.broadcast %cst_4 : f32 to vector<1x128xf32>
    %220 = arith.maximumf %144, %219 : vector<1x128xf32>
    %cst_5 = arith.constant 0.000000e+00 : f32
    %221 = vector.broadcast %cst_5 : f32 to vector<1x128xf32>
    %222 = arith.maximumf %178, %221 : vector<1x128xf32>
    %cst_6 = arith.constant 0.000000e+00 : f32
    %223 = vector.broadcast %cst_6 : f32 to vector<1x128xf32>
    %224 = arith.maximumf %212, %223 : vector<1x128xf32>
    %c54 = arith.constant 54 : index
    %225 = memref.load %arg1[%c54] : memref<87xf32, #tpu.memory_space<smem>>
    %226 = vector.broadcast %225 : f32 to vector<1x128xf32>
    %227 = arith.mulf %226, %214 : vector<1x128xf32>
    %c78 = arith.constant 78 : index
    %228 = memref.load %arg1[%c78] : memref<87xf32, #tpu.memory_space<smem>>
    %229 = vector.broadcast %228 : f32 to vector<1x128xf32>
    %230 = arith.addf %227, %229 : vector<1x128xf32>
    %c55 = arith.constant 55 : index
    %231 = memref.load %arg1[%c55] : memref<87xf32, #tpu.memory_space<smem>>
    %232 = vector.broadcast %231 : f32 to vector<1x128xf32>
    %233 = arith.mulf %232, %216 : vector<1x128xf32>
    %234 = arith.addf %230, %233 : vector<1x128xf32>
    %c56 = arith.constant 56 : index
    %235 = memref.load %arg1[%c56] : memref<87xf32, #tpu.memory_space<smem>>
    %236 = vector.broadcast %235 : f32 to vector<1x128xf32>
    %237 = arith.mulf %236, %218 : vector<1x128xf32>
    %238 = arith.addf %234, %237 : vector<1x128xf32>
    %c57 = arith.constant 57 : index
    %239 = memref.load %arg1[%c57] : memref<87xf32, #tpu.memory_space<smem>>
    %240 = vector.broadcast %239 : f32 to vector<1x128xf32>
    %241 = arith.mulf %240, %220 : vector<1x128xf32>
    %242 = arith.addf %238, %241 : vector<1x128xf32>
    %c58 = arith.constant 58 : index
    %243 = memref.load %arg1[%c58] : memref<87xf32, #tpu.memory_space<smem>>
    %244 = vector.broadcast %243 : f32 to vector<1x128xf32>
    %245 = arith.mulf %244, %222 : vector<1x128xf32>
    %246 = arith.addf %242, %245 : vector<1x128xf32>
    %c59 = arith.constant 59 : index
    %247 = memref.load %arg1[%c59] : memref<87xf32, #tpu.memory_space<smem>>
    %248 = vector.broadcast %247 : f32 to vector<1x128xf32>
    %249 = arith.mulf %248, %224 : vector<1x128xf32>
    %250 = arith.addf %246, %249 : vector<1x128xf32>
    %c60 = arith.constant 60 : index
    %251 = memref.load %arg1[%c60] : memref<87xf32, #tpu.memory_space<smem>>
    %252 = vector.broadcast %251 : f32 to vector<1x128xf32>
    %253 = arith.mulf %252, %214 : vector<1x128xf32>
    %c79 = arith.constant 79 : index
    %254 = memref.load %arg1[%c79] : memref<87xf32, #tpu.memory_space<smem>>
    %255 = vector.broadcast %254 : f32 to vector<1x128xf32>
    %256 = arith.addf %253, %255 : vector<1x128xf32>
    %c61 = arith.constant 61 : index
    %257 = memref.load %arg1[%c61] : memref<87xf32, #tpu.memory_space<smem>>
    %258 = vector.broadcast %257 : f32 to vector<1x128xf32>
    %259 = arith.mulf %258, %216 : vector<1x128xf32>
    %260 = arith.addf %256, %259 : vector<1x128xf32>
    %c62 = arith.constant 62 : index
    %261 = memref.load %arg1[%c62] : memref<87xf32, #tpu.memory_space<smem>>
    %262 = vector.broadcast %261 : f32 to vector<1x128xf32>
    %263 = arith.mulf %262, %218 : vector<1x128xf32>
    %264 = arith.addf %260, %263 : vector<1x128xf32>
    %c63 = arith.constant 63 : index
    %265 = memref.load %arg1[%c63] : memref<87xf32, #tpu.memory_space<smem>>
    %266 = vector.broadcast %265 : f32 to vector<1x128xf32>
    %267 = arith.mulf %266, %220 : vector<1x128xf32>
    %268 = arith.addf %264, %267 : vector<1x128xf32>
    %c64 = arith.constant 64 : index
    %269 = memref.load %arg1[%c64] : memref<87xf32, #tpu.memory_space<smem>>
    %270 = vector.broadcast %269 : f32 to vector<1x128xf32>
    %271 = arith.mulf %270, %222 : vector<1x128xf32>
    %272 = arith.addf %268, %271 : vector<1x128xf32>
    %c65 = arith.constant 65 : index
    %273 = memref.load %arg1[%c65] : memref<87xf32, #tpu.memory_space<smem>>
    %274 = vector.broadcast %273 : f32 to vector<1x128xf32>
    %275 = arith.mulf %274, %224 : vector<1x128xf32>
    %276 = arith.addf %272, %275 : vector<1x128xf32>
    %c66 = arith.constant 66 : index
    %277 = memref.load %arg1[%c66] : memref<87xf32, #tpu.memory_space<smem>>
    %278 = vector.broadcast %277 : f32 to vector<1x128xf32>
    %279 = arith.mulf %278, %214 : vector<1x128xf32>
    %c80 = arith.constant 80 : index
    %280 = memref.load %arg1[%c80] : memref<87xf32, #tpu.memory_space<smem>>
    %281 = vector.broadcast %280 : f32 to vector<1x128xf32>
    %282 = arith.addf %279, %281 : vector<1x128xf32>
    %c67 = arith.constant 67 : index
    %283 = memref.load %arg1[%c67] : memref<87xf32, #tpu.memory_space<smem>>
    %284 = vector.broadcast %283 : f32 to vector<1x128xf32>
    %285 = arith.mulf %284, %216 : vector<1x128xf32>
    %286 = arith.addf %282, %285 : vector<1x128xf32>
    %c68 = arith.constant 68 : index
    %287 = memref.load %arg1[%c68] : memref<87xf32, #tpu.memory_space<smem>>
    %288 = vector.broadcast %287 : f32 to vector<1x128xf32>
    %289 = arith.mulf %288, %218 : vector<1x128xf32>
    %290 = arith.addf %286, %289 : vector<1x128xf32>
    %c69 = arith.constant 69 : index
    %291 = memref.load %arg1[%c69] : memref<87xf32, #tpu.memory_space<smem>>
    %292 = vector.broadcast %291 : f32 to vector<1x128xf32>
    %293 = arith.mulf %292, %220 : vector<1x128xf32>
    %294 = arith.addf %290, %293 : vector<1x128xf32>
    %c70 = arith.constant 70 : index
    %295 = memref.load %arg1[%c70] : memref<87xf32, #tpu.memory_space<smem>>
    %296 = vector.broadcast %295 : f32 to vector<1x128xf32>
    %297 = arith.mulf %296, %222 : vector<1x128xf32>
    %298 = arith.addf %294, %297 : vector<1x128xf32>
    %c71 = arith.constant 71 : index
    %299 = memref.load %arg1[%c71] : memref<87xf32, #tpu.memory_space<smem>>
    %300 = vector.broadcast %299 : f32 to vector<1x128xf32>
    %301 = arith.mulf %300, %224 : vector<1x128xf32>
    %302 = arith.addf %298, %301 : vector<1x128xf32>
    %c72 = arith.constant 72 : index
    %303 = memref.load %arg1[%c72] : memref<87xf32, #tpu.memory_space<smem>>
    %304 = vector.broadcast %303 : f32 to vector<1x128xf32>
    %305 = arith.mulf %304, %214 : vector<1x128xf32>
    %c81 = arith.constant 81 : index
    %306 = memref.load %arg1[%c81] : memref<87xf32, #tpu.memory_space<smem>>
    %307 = vector.broadcast %306 : f32 to vector<1x128xf32>
    %308 = arith.addf %305, %307 : vector<1x128xf32>
    %c73 = arith.constant 73 : index
    %309 = memref.load %arg1[%c73] : memref<87xf32, #tpu.memory_space<smem>>
    %310 = vector.broadcast %309 : f32 to vector<1x128xf32>
    %311 = arith.mulf %310, %216 : vector<1x128xf32>
    %312 = arith.addf %308, %311 : vector<1x128xf32>
    %c74 = arith.constant 74 : index
    %313 = memref.load %arg1[%c74] : memref<87xf32, #tpu.memory_space<smem>>
    %314 = vector.broadcast %313 : f32 to vector<1x128xf32>
    %315 = arith.mulf %314, %218 : vector<1x128xf32>
    %316 = arith.addf %312, %315 : vector<1x128xf32>
    %c75 = arith.constant 75 : index
    %317 = memref.load %arg1[%c75] : memref<87xf32, #tpu.memory_space<smem>>
    %318 = vector.broadcast %317 : f32 to vector<1x128xf32>
    %319 = arith.mulf %318, %220 : vector<1x128xf32>
    %320 = arith.addf %316, %319 : vector<1x128xf32>
    %c76 = arith.constant 76 : index
    %321 = memref.load %arg1[%c76] : memref<87xf32, #tpu.memory_space<smem>>
    %322 = vector.broadcast %321 : f32 to vector<1x128xf32>
    %323 = arith.mulf %322, %222 : vector<1x128xf32>
    %324 = arith.addf %320, %323 : vector<1x128xf32>
    %c77 = arith.constant 77 : index
    %325 = memref.load %arg1[%c77] : memref<87xf32, #tpu.memory_space<smem>>
    %326 = vector.broadcast %325 : f32 to vector<1x128xf32>
    %327 = arith.mulf %326, %224 : vector<1x128xf32>
    %328 = arith.addf %324, %327 : vector<1x128xf32>
    %cst_7 = arith.constant 0.000000e+00 : f32
    %329 = vector.broadcast %cst_7 : f32 to vector<1x128xf32>
    %330 = arith.maximumf %250, %329 : vector<1x128xf32>
    %cst_8 = arith.constant 0.000000e+00 : f32
    %331 = vector.broadcast %cst_8 : f32 to vector<1x128xf32>
    %332 = arith.maximumf %276, %331 : vector<1x128xf32>
    %cst_9 = arith.constant 0.000000e+00 : f32
    %333 = vector.broadcast %cst_9 : f32 to vector<1x128xf32>
    %334 = arith.maximumf %302, %333 : vector<1x128xf32>
    %cst_10 = arith.constant 0.000000e+00 : f32
    %335 = vector.broadcast %cst_10 : f32 to vector<1x128xf32>
    %336 = arith.maximumf %328, %335 : vector<1x128xf32>
    %c82 = arith.constant 82 : index
    %337 = memref.load %arg1[%c82] : memref<87xf32, #tpu.memory_space<smem>>
    %338 = vector.broadcast %337 : f32 to vector<1x128xf32>
    %339 = arith.mulf %338, %330 : vector<1x128xf32>
    %c86 = arith.constant 86 : index
    %340 = memref.load %arg1[%c86] : memref<87xf32, #tpu.memory_space<smem>>
    %341 = vector.broadcast %340 : f32 to vector<1x128xf32>
    %342 = arith.addf %339, %341 : vector<1x128xf32>
    %c83 = arith.constant 83 : index
    %343 = memref.load %arg1[%c83] : memref<87xf32, #tpu.memory_space<smem>>
    %344 = vector.broadcast %343 : f32 to vector<1x128xf32>
    %345 = arith.mulf %344, %332 : vector<1x128xf32>
    %346 = arith.addf %342, %345 : vector<1x128xf32>
    %c84 = arith.constant 84 : index
    %347 = memref.load %arg1[%c84] : memref<87xf32, #tpu.memory_space<smem>>
    %348 = vector.broadcast %347 : f32 to vector<1x128xf32>
    %349 = arith.mulf %348, %334 : vector<1x128xf32>
    %350 = arith.addf %346, %349 : vector<1x128xf32>
    %c85 = arith.constant 85 : index
    %351 = memref.load %arg1[%c85] : memref<87xf32, #tpu.memory_space<smem>>
    %352 = vector.broadcast %351 : f32 to vector<1x128xf32>
    %353 = arith.mulf %352, %336 : vector<1x128xf32>
    %354 = arith.addf %350, %353 : vector<1x128xf32>
    %cst_11 = arith.constant 5.000000e-01 : f32
    %355 = vector.broadcast %cst_11 : f32 to vector<1x128xf32>
    %356 = arith.mulf %355, %354 : vector<1x128xf32>
    %357 = math.tanh %356 : vector<1x128xf32>
    %cst_12 = arith.constant 1.000000e+00 : f32
    %358 = vector.broadcast %cst_12 : f32 to vector<1x128xf32>
    %359 = arith.addf %357, %358 : vector<1x128xf32>
    %cst_13 = arith.constant 5.000000e-01 : f32
    %360 = vector.broadcast %cst_13 : f32 to vector<1x128xf32>
    %361 = arith.mulf %360, %359 : vector<1x128xf32>
    %c0_14 = arith.constant 0 : index
    %c0_15 = arith.constant 0 : index
    %362 = vector.load %arg3[%c0_14, %c0_15] : memref<1x128xf32, #tpu.memory_space<vmem>>, vector<1x128xf32>
    tpu.vector_store %arg3[%c0_14, %c0_15], %361 {strides = array<i32>} : memref<1x128xf32, #tpu.memory_space<vmem>>, vector<1x128xf32>,
    return
  }
  func.func @transform_0(%arg0: i32) -> i32 {
    %c0_i32 = arith.constant 0 : i32
    %c0_i32_0 = arith.constant 0 : i32
    return %c0_i32 : i32
  }
  func.func @transform_1(%arg0: i32) -> (i32, i32) {
    %c0_i32 = arith.constant 0 : i32
    %c0_i32_0 = arith.constant 0 : i32
    return %c0_i32, %arg0 : i32, i32
  }
  func.func @transform_2(%arg0: i32) -> (i32, i32) {
    %c0_i32 = arith.constant 0 : i32
    %c0_i32_0 = arith.constant 0 : i32
    return %c0_i32, %arg0 : i32, i32
  }
}

</mosaic_0001>

<bundles_post_ra>
// kernel: tpu_custom_call.1
= control target key start
LH: loop header
LB: loop body
LE: loop exit
PB: predicated region body
PF: predicated region fallthrough
CT: control target
= control target key end

     0   :  { %7 = vsyncpa [#allocation5], 0  ;;  %s1050_s0 = inlined_call_operand.hbm [shape: f32[87], index: 0, kind: input, shape index: {}]   ;;  %s1051_s1 = inlined_call_operand.hbm [shape: f32[8,128], index: 1, kind: input, shape index: {}]   ;;  %s1052_s2 = inlined_call_operand.hbm [shape: f32[1,128], index: 2, kind: output, shape index: {}]  }
   0x1   :  { %8 = vsyncpa [#allocation3], 0 }
   0x2   :  { %9 = vsyncpa [#allocation4], 0  ;;  %s610_s11 = scalar_lea.hbm %s1050_s0, 16 }
   0x3   :  { %p611_p0 = scmp.ne.s32.totalorder %s1050_s0, %s610_s11  ;;  %p614_p1 = scmp.lt.u32.totalorder %s610_s11, %s1050_s0 }
   0x5   :  { %p616_p2 = pnand %p614_p1, %p611_p0 }
   0x7   :  { %619 = shalt.err (!%p616_p2)
}
   0x8   :  { %s670_s16 = smov [#allocation2]   ;;  %s671_s19 = smov [#allocation6]  }
   0x9   :  { %17 = dma.hbm_to_smem %s1050_s0, 16, %s670_s16, [#allocation5]  }
   0xa   :  { %s24_s20 = sshll.u32 %s671_s19, 4  ;;  %s620_s23 = scalar_lea.hbm %s1051_s1, 128  ;;  %s25_s20 = int_to_ptr.vmem [resolvable:$true] %s24_s20 }
   0xb   :  { %p621_p3 = scmp.ne.s32.totalorder %s1051_s1, %s620_s23  ;;  %p624_p4 = scmp.lt.u32.totalorder %s620_s23, %s1051_s1 }
   0xd   :  { %p626_p5 = pnand %p624_p4, %p621_p3 }
   0xf   :  { %629 = shalt.err (!%p626_p5)
}
  0x10   :  { %s630_s28 = scalar_lea.vmem %s25_s20, 128  ;;  %p635_p7 = scmp.lt.s32.totalorder %s25_s20, %s25_s20 }
  0x11   :  { %p631_p6 = scmp.ne.s32.totalorder %s25_s20, %s630_s28  ;;  %p636_p8 = scmp.lt.s32.totalorder %s630_s28, %s630_s28 }
  0x13   :  { %p637_p9 = por %p636_p8, %p635_p7 }
  0x15   :  { %p638_p10 = pnand %p637_p9, %p631_p6 }
  0x17   :  { %641 = shalt.err (!%p638_p10)
}
  0x18   :  { %27 = dma.hbm_to_vmem [thread:$0]  %s1051_s1, 128, %s25_s20, [#allocation3]  }
  0x19   :  { %664 = dma.done.wait [#allocation5], 16  }
  0x1a   :  { %665 = vsyncadd [#allocation5], 4294967280 }
  0x1b   :  { %666 = dma.done.wait [#allocation3], 128  }
  0x1c   :  { %667 = vsyncadd [#allocation3], 4294967168 }
  0x1d   :  { %34 = sfence }
  0x1e   :  { %s36_s30 = sld [smem:[#allocation2]]  ;;  %s520_s4 = sld [smem:[#allocation2 + $0x1]]  ;;  %v714_v0 = vld [vmem:[#allocation6] sm:$0xff] }
  0x1f   :  { %s519_s3 = sld [smem:[#allocation2 + $0x30]]  ;;  %s521_s5 = sld [smem:[#allocation2 + $0x2]] }
  0x20   :  { %s522_s6 = sld [smem:[#allocation2 + $0x3]]  ;;  %s523_s7 = sld [smem:[#allocation2 + $0x4]] }
  0x21   :  { %s524_s8 = sld [smem:[#allocation2 + $0x5]]  ;;  %s712_s9 = sld [smem:[#allocation2 + $0x6]] }
  0x22   :  { %s716_s10 = sld [smem:[#allocation2 + $0x7]]  ;;  %s718_s11 = sld [smem:[#allocation2 + $0x8]] }
  0x23   :  { %s720_s1 = sld [smem:[#allocation2 + $0x31]]  ;;  %s724_s13 = sld [smem:[#allocation2 + $0xa]] }
  0x24   :  { %s722_s12 = sld [smem:[#allocation2 + $0x9]]  ;;  %v37_v1 = vstv %s36_s30  ;;  %v43_v4 = vstv %s520_s4  ;;  %s727_s14 = sld [smem:[#allocation2 + $0xb]] }
  0x25   :  { %v40_v2 = vstv %s519_s3  ;;  %v38_v3 = vmul.f32 %v37_v1, %v714_v0  ;;  %v50_v5 = vstv %s521_s5  ;;  %s729_s15 = sld [smem:[#allocation2 + $0xc]]  ;;  %v44_v6 = vmul.f32 %v43_v4, %v714_v0  ;;  %s733_s16 = sld [smem:[#allocation2 + $0xd]] }
  0x26   :  { %v51_v7 = vmul.f32 %v50_v5, %v714_v0  ;;  %v57_v8 = vstv %s522_s6  ;;  %v64_v9 = vstv %s523_s7  ;;  %s737_s17 = sld [smem:[#allocation2 + $0xe]]  ;;  %s739_s18 = sld [smem:[#allocation2 + $0xf]] }
  0x27   :  { %v41_v10 = vadd.f32 %v40_v2, %v38_v3  ;;  %v58_v11 = vmul.f32 %v57_v8, %v714_v0  ;;  %v65_v12 = vmul.f32 %v64_v9, %v714_v0  ;;  %v71_v13 = vstv %s524_s8  ;;  %s745_s19 = sld [smem:[#allocation2 + $0x10]]  ;;  %s749_s20 = sld [smem:[#allocation2 + $0x32]] }
  0x28   :  { %v46_v14 = vrot.slane %v44_v6, 1  ;;  %v53_v15 = vrot.slane %v51_v7, 2  ;;  %v72_v16 = vmul.f32 %v71_v13, %v714_v0  ;;  %v78_v17 = vstv %s712_s9  ;;  %s754_s21 = sld [smem:[#allocation2 + $0x11]]  ;;  %s758_s22 = sld [smem:[#allocation2 + $0x12]] }
  0x29   :  { %v60_v18 = vrot.slane %v58_v11, 3  ;;  %v67_v19 = vrot.slane %v65_v12, 4  ;;  %v79_v20 = vmul.f32 %v78_v17, %v714_v0  ;;  %v85_v21 = vstv %s716_s10  ;;  %s760_s23 = sld [smem:[#allocation2 + $0x13]]  ;;  %s765_s24 = sld [smem:[#allocation2 + $0x14]] }
  0x2a   :  { %v48_v22 = vadd.f32 %v46_v14, %v41_v10  ;;  %v74_v23 = vrot.slane %v72_v16, 5  ;;  %v86_v24 = vmul.f32 %v85_v21, %v714_v0  ;;  %v92_v25 = vstv %s718_s11  ;;  %s767_s25 = sld [smem:[#allocation2 + $0x15]]  ;;  %s774_s26 = sld [smem:[#allocation2 + $0x16]] }
  0x2b   :  { %v81_v26 = vrot.slane %v79_v20, 6  ;;  %v93_v27 = vmul.f32 %v92_v25, %v714_v0  ;;  %v95_v28 = vstv %s720_s1  ;;  %v98_v29 = vstv %s722_s12  ;;  %s780_s27 = sld [smem:[#allocation2 + $0x17]]  ;;  %s782_s28 = sld [smem:[#allocation2 + $0x18]] }
  0x2c   :  { %v55_v30 = vadd.f32 %v53_v15, %v48_v22  ;;  %v88_v31 = vrot.slane %v86_v24, 7  ;;  %v99_v32 = vmul.f32 %v98_v29, %v714_v0  ;;  %v105_v33 = vstv %s724_s13  ;;  %s786_s0 = sld [smem:[#allocation2 + $0x33]]  ;;  %s788_s29 = sld [smem:[#allocation2 + $0x19]] }
  0x2d   :  { %v96_v34 = vadd.f32 %v95_v28, %v93_v27  ;;  %v106_v35 = vmul.f32 %v105_v33, %v714_v0  ;;  %v112_v36 = vstv %s727_s14  ;;  %v119_v37 = vstv %s729_s15  ;;  %s791_s30 = sld [smem:[#allocation2 + $0x1a]]  ;;  %s798_s3 = sld [smem:[#allocation2 + $0x1b]] }
  0x2e   :  { %v62_v38 = vadd.f32 %v60_v18, %v55_v30  ;;  %v101_v39 = vrot.slane %v99_v32, 1  ;;  %v113_v40 = vmul.f32 %v112_v36, %v714_v0  ;;  %v120_v41 = vmul.f32 %v119_v37, %v714_v0  ;;  %s800_s4 = sld [smem:[#allocation2 + $0x1c]]  ;;  %s809_s5 = sld [smem:[#allocation2 + $0x1d]] }
  0x2f   :  { %v108_v42 = vrot.slane %v106_v35, 2  ;;  %v126_v43 = vstv %s733_s16  ;;  %v133_v44 = vstv %s737_s17  ;;  %v140_v45 = vstv %s739_s18  ;;  %s811_s6 = sld [smem:[#allocation2 + $0x1e]]  ;;  %s814_s7 = sld [smem:[#allocation2 + $0x1f]] }
  0x30   :  { %v69_v46 = vadd.f32 %v67_v19, %v62_v38  ;;  %v103_v47 = vadd.f32 %v101_v39, %v96_v34  ;;  %v115_v48 = vrot.slane %v113_v40, 3  ;;  %v122_v49 = vrot.slane %v120_v41, 4  ;;  %s817_s8 = sld [smem:[#allocation2 + $0x20]]  ;;  %s824_s9 = sld [smem:[#allocation2 + $0x34]] }
  0x31   :  { %v127_v50 = vmul.f32 %v126_v43, %v714_v0  ;;  %v134_v51 = vmul.f32 %v133_v44, %v714_v0  ;;  %v141_v52 = vmul.f32 %v140_v45, %v714_v0  ;;  %v147_v53 = vstv %s745_s19  ;;  %s826_s10 = sld [smem:[#allocation2 + $0x21]]  ;;  %s831_s11 = sld [smem:[#allocation2 + $0x22]] }
  0x32   :  { %v76_v54 = vadd.f32 %v74_v23, %v69_v46  ;;  %v110_v55 = vadd.f32 %v108_v42, %v103_v47  ;;  %v148_v56 = vmul.f32 %v147_v53, %v714_v0  ;;  %v150_v57 = vstv %s749_s20  ;;  %s837_s1 = sld [smem:[#allocation2 + $0x23]]  ;;  %s839_s12 = sld [smem:[#allocation2 + $0x24]] }
  0x33   :  { %v129_v58 = vrot.slane %v127_v50, 5  ;;  %v136_v59 = vrot.slane %v134_v51, 6  ;;  %v143_v60 = vrot.slane %v141_v52, 7  ;;  %v153_v61 = vstv %s754_s21  ;;  %s843_s13 = sld [smem:[#allocation2 + $0x25]]  ;;  %s847_s14 = sld [smem:[#allocation2 + $0x26]] }
  0x34   :  { %v83_v62 = vadd.f32 %v81_v26, %v76_v54  ;;  %v117_v63 = vadd.f32 %v115_v48, %v110_v55  ;;  %v151_v1 = vadd.f32 %v150_v57, %v148_v56  ;;  %v154_v2 = vmul.f32 %v153_v61, %v714_v0  ;;  %s849_s15 = sld [smem:[#allocation2 + $0x27]]  ;;  %s855_s16 = sld [smem:[#allocation2 + $0x28]] }
  0x35   :  { %v160_v3 = vstv %s758_s22  ;;  %v167_v4 = vstv %s760_s23  ;;  %v174_v5 = vstv %s765_s24  ;;  %v181_v6 = vstv %s767_s25  ;;  %s859_s17 = sld [smem:[#allocation2 + $0x35]]  ;;  %s861_s18 = sld [smem:[#allocation2 + $0x29]] }
  0x36   :  { %v802_v7 = vadd.f32 %v88_v31, %v83_v62  ;;  %v124_v8 = vadd.f32 %v122_v49, %v117_v63  ;;  %v156_v9 = vrot.slane %v154_v2, 1  ;;  %v161_v10 = vmul.f32 %v160_v3, %v714_v0  ;;  %s868_s19 = sld [smem:[#allocation2 + $0x2a]]  ;;  %s873_s20 = sld [smem:[#allocation2 + $0x2b]] }
  0x37   :  { %v168_v11 = vmul.f32 %v167_v4, %v714_v0  ;;  %v175_v12 = vmul.f32 %v174_v5, %v714_v0  ;;  %v182_v13 = vmul.f32 %v181_v6, %v714_v0  ;;  %v188_v14 = vstv %s774_s26  ;;  %s875_s21 = sld [smem:[#allocation2 + $0x2c]]  ;;  %s883_s22 = sld [smem:[#allocation2 + $0x2d]] }
  0x38   :  { %v131_v15 = vadd.f32 %v129_v58, %v124_v8  ;;  %v158_v16 = vadd.f32 %v156_v9, %v151_v1  ;;  %v163_v17 = vrot.slane %v161_v10, 2  ;;  %v189_v18 = vmul.f32 %v188_v14, %v714_v0  ;;  %s885_s23 = sld [smem:[#allocation2 + $0x2e]]  ;;  %s890_s24 = sld [smem:[#allocation2 + $0x2f]] }
  0x39   :  { %v170_v19 = vrot.slane %v168_v11, 3  ;;  %v177_v20 = vrot.slane %v175_v12, 4  ;;  %v184_v21 = vrot.slane %v182_v13, 5  ;;  %v195_v22 = vstv %s780_s27  ;;  %s898_s25 = sld [smem:[#allocation2 + $0x36]]  ;;  %s905_s27 = sld [smem:[#allocation2 + $0x37]] }
  0x3a   :  { %v138_v23 = vadd.f32 %v136_v59, %v131_v15  ;;  %v165_v24 = vadd.f32 %v163_v17, %v158_v16  ;;  %v191_v25 = vrot.slane %v189_v18, 6  ;;  %v196_v26 = vmul.f32 %v195_v22, %v714_v0  ;;  %s900_s26 = sld [smem:[#allocation2 + $0x4e]] }
  0x3b   :  { %v202_v27 = vstv %s782_s28  ;;  %v205_v28 = vstv %s786_s0  ;;  %v208_v29 = vstv %s788_s29  ;;  %v215_v30 = vstv %s791_s30  ;;  %s907_s28 = sld [smem:[#allocation2 + $0x38]]  ;;  %s910_s0 = sld [smem:[#allocation2 + $0x39]] }
  0x3c   :  { %v828_v31 = vadd.f32 %v143_v60, %v138_v23  ;;  %v172_v32 = vadd.f32 %v170_v19, %v165_v24  ;;  %v198_v33 = vrot.slane %v196_v26, 7  ;;  %v203_v34 = vmul.f32 %v202_v27, %v714_v0  ;;  %s915_s29 = sld [smem:[#allocation2 + $0x3a]]  ;;  %s917_s30 = sld [smem:[#allocation2 + $0x3b]] }
  0x3d   :  { %v209_v35 = vmul.f32 %v208_v29, %v714_v0  ;;  %v216_v36 = vmul.f32 %v215_v30, %v714_v0  ;;  %v222_v37 = vstv %s798_s3  ;;  %v229_v38 = vstv %s800_s4  ;;  %s920_s3 = sld [smem:[#allocation2 + $0x3c]]  ;;  %s927_s4 = sld [smem:[#allocation2 + $0x4f]] }
  0x3e   :  { %v179_v39 = vadd.f32 %v177_v20, %v172_v32  ;;  %v206_v40 = vadd.f32 %v205_v28, %v203_v34  ;;  %v223_v41 = vmul.f32 %v222_v37, %v714_v0  ;;  %v230_v42 = vmul.f32 %v229_v38, %v714_v0 }
  0x3f   :  { %v211_v43 = vrot.slane %v209_v35, 1  ;;  %v218_v44 = vrot.slane %v216_v36, 2  ;;  %v236_v45 = vstv %s809_s5  ;;  %v243_v46 = vstv %s811_s6  ;;  %s929_s5 = sld [smem:[#allocation2 + $0x3d]]  ;;  %s932_s6 = sld [smem:[#allocation2 + $0x3e]] }
  0x40   :  { %v186_v47 = vadd.f32 %v184_v21, %v179_v39  ;;  %v225_v48 = vrot.slane %v223_v41, 3  ;;  %v232_v49 = vrot.slane %v230_v42, 4  ;;  %v237_v50 = vmul.f32 %v236_v45, %v714_v0 }
  0x41   :  { %v213_v51 = vadd.f32 %v211_v43, %v206_v40  ;;  %v244_v52 = vmul.f32 %v243_v46, %v714_v0  ;;  %v250_v53 = vstv %s814_s7  ;;  %v257_v54 = vstv %s817_s8  ;;  %s934_s7 = sld [smem:[#allocation2 + $0x3f]]  ;;  %s944_s8 = sld [smem:[#allocation2 + $0x40]] }
  0x42   :  { %v193_v55 = vadd.f32 %v191_v25, %v186_v47  ;;  %v239_v56 = vrot.slane %v237_v50, 5  ;;  %v251_v57 = vmul.f32 %v250_v53, %v714_v0  ;;  %v258_v58 = vmul.f32 %v257_v54, %v714_v0 }
  0x43   :  { %v220_v59 = vadd.f32 %v218_v44, %v213_v51  ;;  %v246_v60 = vrot.slane %v244_v52, 6  ;;  %v260_v61 = vstv %s824_s9  ;;  %v263_v62 = vstv %s826_s10  ;;  %s947_s9 = sld [smem:[#allocation2 + $0x41]]  ;;  %s949_s10 = sld [smem:[#allocation2 + $0x42]] }
  0x44   :  { %v865_v63 = vadd.f32 %v198_v33, %v193_v55  ;;  %v253_v1 = vrot.slane %v251_v57, 7  ;;  %v261_v2 = vadd.f32 %v260_v61, %v258_v58  ;;  %v264_v3 = vmul.f32 %v263_v62, %v714_v0 }
  0x45   :  { %v227_v4 = vadd.f32 %v225_v48, %v220_v59  ;;  %v270_v5 = vstv %s831_s11  ;;  %v277_v6 = vstv %s837_s1  ;;  %v284_v8 = vstv %s839_s12  ;;  %s955_s11 = sld [smem:[#allocation2 + $0x50]]  ;;  %s961_s1 = sld [smem:[#allocation2 + $0x43]] }
  0x46   :  { %v266_v9 = vrot.slane %v264_v3, 1  ;;  %v271_v10 = vmul.f32 %v270_v5, %v714_v0  ;;  %v278_v11 = vmul.f32 %v277_v6, %v714_v0  ;;  %v285_v12 = vmul.f32 %v284_v8, %v714_v0  ;;  %s963_s12 = sld [smem:[#allocation2 + $0x44]] }
  0x47   :  { %v234_v13 = vadd.f32 %v232_v49, %v227_v4  ;;  %v291_v14 = vstv %s843_s13  ;;  %v298_v15 = vstv %s847_s14  ;;  %v305_v16 = vstv %s849_s15  ;;  %s971_s13 = sld [smem:[#allocation2 + $0x45]]  ;;  %s976_s14 = sld [smem:[#allocation2 + $0x46]] }
  0x48   :  { %v268_v17 = vadd.f32 %v266_v9, %v261_v2  ;;  %v273_v18 = vrot.slane %v271_v10, 2  ;;  %v280_v19 = vrot.slane %v278_v11, 3  ;;  %v287_v20 = vrot.slane %v285_v12, 4  ;;  %s981_s15 = sld [smem:[#allocation2 + $0x47]] }
  0x49   :  { %v241_v21 = vadd.f32 %v239_v56, %v234_v13  ;;  %v292_v22 = vmul.f32 %v291_v14, %v714_v0  ;;  %v299_v23 = vmul.f32 %v298_v15, %v714_v0  ;;  %v306_v24 = vmul.f32 %v305_v16, %v714_v0 }
  0x4a   :  { %v275_v25 = vadd.f32 %v273_v18, %v268_v17  ;;  %v312_v26 = vstv %s855_s16  ;;  %v315_v27 = vstv %s859_s17  ;;  %v318_v28 = vstv %s861_s18  ;;  %s983_s16 = sld [smem:[#allocation2 + $0x48]]  ;;  %s987_s17 = sld [smem:[#allocation2 + $0x51]] }
  0x4b   :  { %v248_v29 = vadd.f32 %v246_v60, %v241_v21  ;;  %v294_v30 = vrot.slane %v292_v22, 5  ;;  %v301_v32 = vrot.slane %v299_v23, 6  ;;  %v308_v33 = vrot.slane %v306_v24, 7  ;;  %s989_s18 = sld [smem:[#allocation2 + $0x49]] }
  0x4c   :  { %v282_v34 = vadd.f32 %v280_v19, %v275_v25  ;;  %v313_v35 = vmul.f32 %v312_v26, %v714_v0  ;;  %v319_v36 = vmul.f32 %v318_v28, %v714_v0  ;;  %v325_v37 = vstv %s868_s19  ;;  %s994_s19 = sld [smem:[#allocation2 + $0x4a]] }
  0x4d   :  { %v255_v38 = vadd.f32 %v253_v1, %v248_v29  ;;  %v326_v39 = vmul.f32 %v325_v37, %v714_v0  ;;  %v332_v40 = vstv %s873_s20  ;;  %v339_v41 = vstv %s875_s21  ;;  %s996_s20 = sld [smem:[#allocation2 + $0x4b]]  ;;  %s1003_s21 = sld [smem:[#allocation2 + $0x4c]] }
  0x4e   :  { %v289_v42 = vadd.f32 %v287_v20, %v282_v34  ;;  %v316_v43 = vadd.f32 %v315_v27, %v313_v35  ;;  %v321_v44 = vrot.slane %v319_v36, 1  ;;  %v333_v45 = vmul.f32 %v332_v40, %v714_v0 }
  0x4f   :  { %v328_v46 = vrot.slane %v326_v39, 2  ;;  %v340_v47 = vmul.f32 %v339_v41, %v714_v0  ;;  %v346_v48 = vstv %s883_s22  ;;  %v353_v49 = vstv %s885_s23  ;;  %s1006_s22 = sld [smem:[#allocation2 + $0x4d]]  ;;  %s1010_s23 = sld [smem:[#allocation2 + $0x52]] }
  0x50   :  { %v296_v50 = vadd.f32 %v294_v30, %v289_v42  ;;  %v323_v51 = vadd.f32 %v321_v44, %v316_v43  ;;  %v335_v52 = vrot.slane %v333_v45, 3  ;;  %v347_v53 = vmul.f32 %v346_v48, %v714_v0 }
  0x51   :  { %v342_v54 = vrot.slane %v340_v47, 4  ;;  %v354_v55 = vmul.f32 %v353_v49, %v714_v0  ;;  %v360_v56 = vstv %s890_s24  ;;  %v925_v57 = vmax.f32 %v802_v7, 0.0  ;;  %s1014_s24 = sld [smem:[#allocation2 + $0x56]] }
  0x52   :  { %v303_v58 = vadd.f32 %v301_v32, %v296_v50  ;;  %v330_v59 = vadd.f32 %v328_v46, %v323_v51  ;;  %v349_v60 = vrot.slane %v347_v53, 5  ;;  %v361_v61 = vmul.f32 %v360_v56, %v714_v0 }
  0x53   :  { %v356_v62 = vrot.slane %v354_v55, 6  ;;  %v937_v7 = vmax.f32 %v828_v31, 0.0  ;;  %v940_v1 = vmax.f32 %v865_v63, 0.0  ;;  %v942_v2 = vmax.f32 %v255_v38, 0.0 }
  0x54   :  { %v310_v3 = vadd.f32 %v308_v33, %v303_v58  ;;  %v337_v4 = vadd.f32 %v335_v52, %v330_v59  ;;  %v363_v0 = vrot.slane %v361_v61, 7  ;;  %v373_v5 = vstv %s898_s25  ;;  %s1016_s25 = sld [smem:[#allocation2 + $0x53]] }
  0x55   :  { %v374_v31 = vmul.f32 %v373_v5, %v925_v57  ;;  %v376_v6 = vstv %s900_s26  ;;  %v379_v63 = vstv %s905_s27  ;;  %v383_v8 = vstv %s907_s28  ;;  %s1021_s26 = sld [smem:[#allocation2 + $0x54]]  ;;  %s604_s27 = sld [smem:[#allocation2 + $0x55]] }
  0x56   :  { %v344_v9 = vadd.f32 %v342_v54, %v337_v4  ;;  %v957_v10 = vmax.f32 %v310_v3, 0.0  ;;  %v380_v11 = vmul.f32 %v379_v63, %v937_v7  ;;  %v384_v12 = vmul.f32 %v383_v8, %v940_v1  ;;  %s672_s28 = smov [#allocation7]  }
  0x57   :  { %v377_v13 = vadd.f32 %v376_v6, %v374_v31  ;;  %v387_v14 = vstv %s910_s0  ;;  %v391_v15 = vstv %s915_s29  ;;  %v395_v16 = vstv %s917_s30  ;;  %s509_s0 = sshll.u32 %s672_s28, 4  ;;  %s510_s0 = int_to_ptr.vmem [resolvable:$true] %s509_s0 }
  0x58   :  { %v351_v17 = vadd.f32 %v349_v60, %v344_v9  ;;  %v388_v18 = vmul.f32 %v387_v14, %v942_v2  ;;  %v392_v19 = vmul.f32 %v391_v15, %v957_v10  ;;  %v399_v20 = vstv %s920_s3  ;;  %s642_s29 = scalar_lea.vmem %s510_s0, 16  ;;  %s646_s30 = scalar_lea.vmem %s510_s0, 32 }
  0x59   :  { %v381_v21 = vadd.f32 %v380_v11, %v377_v13  ;;  %v400_v22 = vmul.f32 %v399_v20, %v925_v57  ;;  %v402_v23 = vstv %s927_s4  ;;  %v405_v24 = vstv %s929_s5  ;;  %p643_p11 = scmp.ne.s32.totalorder %s510_s0, %s642_s29  ;;  %p647_p12 = scmp.lt.s32.totalorder %s510_s0, %s510_s0 }
  0x5a   :  { %v358_v25 = vadd.f32 %v356_v62, %v351_v17  ;;  %v406_v26 = vmul.f32 %v405_v24, %v937_v7  ;;  %v409_v27 = vstv %s932_s6  ;;  %v413_v28 = vstv %s934_s7  ;;  %p648_p13 = scmp.lt.s32.totalorder %s646_s30, %s642_s29 }
  0x5b   :  { %v385_v29 = vadd.f32 %v384_v12, %v381_v21  ;;  %v403_v30 = vadd.f32 %v402_v23, %v400_v22  ;;  %v410_v32 = vmul.f32 %v409_v27, %v940_v1  ;;  %v414_v33 = vmul.f32 %v413_v28, %v942_v2 }
  0x5c   :  { %v365_v34 = vadd.f32 %v363_v0, %v358_v25  ;;  %v417_v35 = vstv %s944_s8  ;;  %v421_v36 = vstv %s947_s9  ;;  %v425_v37 = vstv %s949_s10  ;;  %p649_p0 = por %p648_p13, %p647_p12 }
  0x5d   :  { %v389_v38 = vadd.f32 %v388_v18, %v385_v29  ;;  %v407_v39 = vadd.f32 %v406_v26, %v403_v30  ;;  %v418_v40 = vmul.f32 %v417_v35, %v957_v10  ;;  %v426_v41 = vmul.f32 %v425_v37, %v925_v57 }
  0x5e   :  { %v371_v42 = vmax.f32 %v365_v34, 0.0  ;;  %v428_v43 = vstv %s955_s11  ;;  %v431_v44 = vstv %s961_s1  ;;  %v435_v45 = vstv %s963_s12  ;;  %p650_p1 = pnand %p649_p0, %p643_p11 }
  0x5f   :  { %v393_v46 = vadd.f32 %v392_v19, %v389_v38  ;;  %v411_v47 = vadd.f32 %v410_v32, %v407_v39  ;;  %v429_v48 = vadd.f32 %v428_v43, %v426_v41  ;;  %v432_v49 = vmul.f32 %v431_v44, %v937_v7 }
  0x60   :  { %v396_v50 = vmul.f32 %v395_v16, %v371_v42  ;;  %v422_v51 = vmul.f32 %v421_v36, %v371_v42  ;;  %v436_v52 = vmul.f32 %v435_v45, %v940_v1  ;;  %v439_v53 = vstv %s971_s13 }
  0x61   :  { %v415_v54 = vadd.f32 %v414_v33, %v411_v47  ;;  %v433_v55 = vadd.f32 %v432_v49, %v429_v48  ;;  %v440_v56 = vmul.f32 %v439_v53, %v942_v2  ;;  %v443_v58 = vstv %s976_s14 }
  0x62   :  { %v397_v59 = vadd.f32 %v396_v50, %v393_v46  ;;  %v444_v60 = vmul.f32 %v443_v58, %v957_v10  ;;  %v447_v61 = vstv %s981_s15  ;;  %v451_v62 = vstv %s983_s16 }
  0x63   :  { %v419_v3 = vadd.f32 %v418_v40, %v415_v54  ;;  %v437_v4 = vadd.f32 %v436_v52, %v433_v55  ;;  %v448_v0 = vmul.f32 %v447_v61, %v371_v42  ;;  %v452_v5 = vmul.f32 %v451_v62, %v925_v57 }
  0x64   :  { %v454_v31 = vstv %s987_s17  ;;  %v457_v6 = vstv %s989_s18  ;;  %v461_v63 = vstv %s994_s19  ;;  %v465_v8 = vstv %s996_s20 }
  0x65   :  { %v423_v9 = vadd.f32 %v422_v51, %v419_v3  ;;  %v441_v11 = vadd.f32 %v440_v56, %v437_v4  ;;  %v455_v12 = vadd.f32 %v454_v31, %v452_v5  ;;  %v458_v13 = vmul.f32 %v457_v6, %v937_v7 }
  0x66   :  { %v462_v14 = vmul.f32 %v461_v63, %v940_v1  ;;  %v469_v15 = vstv %s1003_s21  ;;  %v466_v57 = vmul.f32 %v465_v8, %v942_v2  ;;  %v473_v18 = vstv %s1006_s22 }
  0x67   :  { %v445_v16 = vadd.f32 %v444_v60, %v441_v11  ;;  %v459_v17 = vadd.f32 %v458_v13, %v455_v12  ;;  %v470_v19 = vmul.f32 %v469_v15, %v957_v10  ;;  %v476_v20 = vmax.f32 %v397_v59, 0.0 }
  0x68   :  { %v477_v21 = vmax.f32 %v423_v9, 0.0  ;;  %v481_v22 = vstv %s1010_s23  ;;  %v484_v25 = vstv %s1014_s24  ;;  %v487_v26 = vstv %s1016_s25 }
  0x69   :  { %v449_v23 = vadd.f32 %v448_v0, %v445_v16  ;;  %v463_v24 = vadd.f32 %v462_v14, %v459_v17  ;;  %v482_v7 = vmul.f32 %v481_v22, %v476_v20  ;;  %v491_v1 = vstv %s1021_s26 }
  0x6a   :  { %v488_v27 = vmul.f32 %v487_v26, %v477_v21  ;;  %v474_v29 = vmul.f32 %v473_v18, %v371_v42  ;;  %v495_v10 = vstv %s604_s27 }
  0x6b   :  { %v467_v28 = vadd.f32 %v466_v57, %v463_v24  ;;  %v478_v30 = vmax.f32 %v449_v23, 0.0  ;;  %v485_v32 = vadd.f32 %v484_v25, %v482_v7 }
  0x6d   :  { %v471_v33 = vadd.f32 %v470_v19, %v467_v28  ;;  %v492_v2 = vmul.f32 %v491_v1, %v478_v30  ;;  %v489_v34 = vadd.f32 %v488_v27, %v485_v32 }
  0x6f   :  { %v475_v35 = vadd.f32 %v474_v29, %v471_v33  ;;  %v493_v37 = vadd.f32 %v492_v2, %v489_v34 }
  0x71   :  { %v479_v36 = vmax.f32 %v475_v35, 0.0 }
  0x73   :  { %v496_v38 = vmul.f32 %v495_v10, %v479_v36 }
  0x75   :  { %v497_v39 = vadd.f32 %v496_v38, %v493_v37 }
  0x77   :  { %v498_v40 = vmul.f32 0.5, %v497_v39 }
  0x79   :  { %608 = vtanh.f32 %v498_v40 }
  0x83   :  { %v609_v41 = vpop.eup %608 }
  0x84   :  { %v500_v43 = vadd.f32 1.0, %v609_v41 }
  0x86   :  { %v501_v44 = vmul.f32 0.5, %v500_v43 }
  0x88   :  { %502 = vst [vmem:[#allocation7] sm:$0x1] %v501_v44 }
  0x89   :  { %653 = shalt.err (!%p650_p1)
}
  0x8a   :  { %s654_s5 = scalar_lea.hbm %s1052_s2, 16 }
  0x8b   :  { %p655_p2 = scmp.ne.s32.totalorder %s1052_s2, %s654_s5  ;;  %p658_p3 = scmp.lt.u32.totalorder %s654_s5, %s1052_s2 }
  0x8d   :  { %p660_p4 = pnand %p658_p3, %p655_p2 }
  0x8f   :  { %663 = shalt.err (!%p660_p4)
}
  0x90   :  { %512 = dma.vmem_to_hbm [thread:$0]  %s510_s0, 16, %s1052_s2, [#allocation4]  }
  0x91   :  { %668 = dma.done.wait [#allocation4], 16  }
  0x92   :  { %669 = vsyncadd [#allocation4], 4294967280 }
  0x93   :  { %516 = vsyncpa [#allocation3], 1 }
  0x94   :  { %517 = vsyncpa [#allocation4], 1 }
  0x95   :  { %518 = vsyncpa [#allocation5], 1 }

</bundles_post_ra>
